<compile_context>
chip_gen: v7x
topology: tpu7x:2x2x1
jax: 0.10.0
libtpu: 0.0.40
codegen_flags: <defaults>
</compile_context>

<pallas_src>
import functools

import jax
import jax.numpy as jnp
from jax.experimental import pallas as pl
from jax.experimental.pallas import tpu as pltpu


def _round_up(x: int, m: int) -> int:
    return ((x + m - 1) // m) * m


def linear_relu_kernel(x_ref, w_ref, b_ref, o_ref, acc_ref):
    # K (reduction) axis is the innermost grid dimension.
    @pl.when(pl.program_id(2) == 0)
    def _():
        acc_ref[...] = jnp.zeros_like(acc_ref)

    # MXU matmul in bf16 with f32 accumulation.
    acc_ref[...] += jnp.dot(
        x_ref[...], w_ref[...], preferred_element_type=jnp.float32
    )

    # Epilogue (bias add + ReLU) in f32, only on the last K step.
    @pl.when(pl.program_id(2) == pl.num_programs(2) - 1)
    def _():
        y = acc_ref[...] + b_ref[...]  # (tm, tn) + (1, tn) broadcast, f32 VPU
        o_ref[...] = jnp.maximum(y, 0.0).astype(o_ref.dtype)


def base_layer_forward(x, w, b, *, tm=None, tn=None, tk=None):
    """relu(x @ w + b).

    x: [B, in_f] (any float dtype), w: [in_f, out_f], b: [out_f].
    Returns [B, out_f] in x.dtype.
    """
    B, in_f = x.shape
    out_f = w.shape[1]

    # Tile sizes: lane-dense (128-multiple) N/K, sublane-friendly M.
    # Caps keep double-buffered bf16 tiles well inside v7x's smaller VMEM.
    if tm is None:
        tm = min(256, _round_up(B, 16))
    if tn is None:
        tn = min(512, _round_up(out_f, 128))
    if tk is None:
        tk = min(256, _round_up(in_f, 128))

    M = _round_up(B, tm)
    N = _round_up(out_f, tn)
    K = _round_up(in_f, tk)

    # Zero-pad to tile multiples and cast matmul operands to bf16.
    xb = jnp.zeros((M, K), jnp.bfloat16).at[:B, :in_f].set(
        x.astype(jnp.bfloat16))
    wb = jnp.zeros((K, N), jnp.bfloat16).at[:in_f, :out_f].set(
        w.astype(jnp.bfloat16))
    b2 = jnp.zeros((1, N), jnp.float32).at[0, :out_f].set(
        b.astype(jnp.float32))

    grid = (M // tm, N // tn, K // tk)

    cost = pl.CostEstimate(
        flops=2 * M * N * K,
        transcendentals=0,
        bytes_accessed=(M * K + K * N) * 2 + M * N * 4 + N * 4,
    )

    out = pl.pallas_call(
        linear_relu_kernel,
        out_shape=jax.ShapeDtypeStruct((M, N), x.dtype),
        grid_spec=pltpu.PrefetchScalarGridSpec(
            num_scalar_prefetch=0,
            grid=grid,
            in_specs=[
                pl.BlockSpec((tm, tk), lambda i, j, k: (i, k)),
                pl.BlockSpec((tk, tn), lambda i, j, k: (k, j)),
                pl.BlockSpec((1, tn), lambda i, j, k: (0, j)),  # bias: N only
            ],
            out_specs=pl.BlockSpec((tm, tn), lambda i, j, k: (i, j)),
            scratch_shapes=[pltpu.VMEM((tm, tn), jnp.float32)],
        ),
        compiler_params=pltpu.CompilerParams(
            dimension_semantics=("parallel", "parallel", "arbitrary"),
        ),
        cost_estimate=cost,
    )(xb, wb, b2)

    return out[:B, :out_f]


def _reference(x, w, b):
    # Reference with the same bf16 operand rounding (f32 accumulate).
    xf = x.astype(jnp.bfloat16).astype(jnp.float32)
    wf = w.astype(jnp.bfloat16).astype(jnp.float32)
    return jnp.maximum(xf @ wf + b.astype(jnp.float32), 0.0).astype(x.dtype)


def _make_params(key, in_features, out_features):
    kw, kb = jax.random.split(key)
    bound = 1.0 / (in_features ** 0.5)
    # PyTorch Linear layout is [out, in]; kernel uses [in, out].
    w_torch = jax.random.uniform(
        kw, (out_features, in_features), jnp.float32, -bound, bound)
    b = jax.random.uniform(kb, (out_features,), jnp.float32, -bound, bound)
    return w_torch.T, b


if __name__ == "__main__":
    key = jax.random.PRNGKey(0)
    k1, k2, k3, k4 = jax.random.split(key, 4)

    # --- Case 1: tiny shapes consistent with BaseLayer(32, 64) --------------
    batch, in_features, out_features = 8, 32, 64
    w1, b1 = _make_params(k1, in_features, out_features)
    x1 = jax.random.normal(k2, (batch, in_features), jnp.float32)

    out1 = jax.block_until_ready(base_layer_forward(x1, w1, b1))
    ref1 = _reference(x1, w1, b1)
    assert out1.shape == (batch, out_features)
    assert jnp.allclose(out1, ref1, atol=1e-2, rtol=1e-2)

    # --- Case 2: shape that actually exercises the (M, N, K) tiling ---------
    B2, in2, out2 = 256, 256, 384
    w2, b2 = _make_params(k3, in2, out2)
    x2 = jax.random.normal(k4, (B2, in2), jnp.float32)

    out2_ = jax.block_until_ready(
        base_layer_forward(x2, w2, b2, tm=128, tn=128, tk=128))  # grid (2,3,2)
    ref2 = _reference(x2, w2, b2)
    assert out2_.shape == (B2, out2)
    assert jnp.allclose(out2_, ref2, atol=5e-2, rtol=5e-2)

    print("KERNEL_OK")
</pallas_src>

<mosaic_0001>
module attributes {stable_mosaic.version = 11 : i64} {
  func.func @linear_relu_kernel(%arg0: i32, %arg1: i32, %arg2: i32, %arg3: memref<16x128xbf16, #tpu.memory_space<vmem>>, %arg4: memref<128x128xbf16, #tpu.memory_space<vmem>>, %arg5: memref<1x128xf32, #tpu.memory_space<vmem>>, %arg6: memref<16x128xf32, #tpu.memory_space<vmem>>, %arg7: memref<16x128xf32, #tpu.memory_space<vmem>>) attributes {dimension_semantics = [#tpu.dimension_semantics<parallel>, #tpu.dimension_semantics<parallel>, #tpu.dimension_semantics<arbitrary>], iteration_bounds = array<i64: 1, 1, 1>, scalar_prefetch = 0 : i64, scratch_operands = 1 : i64, tpu.core_type = #tpu.core_type<tc>, window_params = [{transform_indices = @transform_0, window_bounds = array<i64: 16, 128>}, {transform_indices = @transform_1, window_bounds = array<i64: 128, 128>}, {transform_indices = @transform_2, window_bounds = array<i64: 1, 128>}, {transform_indices = @transform_3, window_bounds = array<i64: 16, 128>}]} {
    %c0_i32 = arith.constant 0 : i32
    %0 = arith.cmpi eq, %arg2, %c0_i32 : i32
    %1 = arith.extui %0 : i1 to i32
    %c0_i32_0 = arith.constant 0 : i32
    %2 = arith.cmpi ne, %1, %c0_i32_0 : i32
    scf.if %2 {
      %cst_10 = arith.constant 0.000000e+00 : f32
      %12 = vector.broadcast %cst_10 : f32 to vector<16x128xf32>
      %c0_11 = arith.constant 0 : index
      %c0_12 = arith.constant 0 : index
      %13 = vector.load %arg7[%c0_11, %c0_12] : memref<16x128xf32, #tpu.memory_space<vmem>>, vector<16x128xf32>
      tpu.vector_store %arg7[%c0_11, %c0_12], %12 {strides = array<i32>} : memref<16x128xf32, #tpu.memory_space<vmem>>, vector<16x128xf32>,
    } else {
    }
    %c0 = arith.constant 0 : index
    %c0_1 = arith.constant 0 : index
    %3 = vector.load %arg7[%c0, %c0_1] : memref<16x128xf32, #tpu.memory_space<vmem>>, vector<16x128xf32>
    %c0_2 = arith.constant 0 : index
    %c0_3 = arith.constant 0 : index
    %4 = vector.load %arg3[%c0_2, %c0_3] : memref<16x128xbf16, #tpu.memory_space<vmem>>, vector<16x128xbf16>
    %c0_4 = arith.constant 0 : index
    %c0_5 = arith.constant 0 : index
    %5 = vector.load %arg4[%c0_4, %c0_5] : memref<128x128xbf16, #tpu.memory_space<vmem>>, vector<128x128xbf16>
    %cst = arith.constant dense<0.000000e+00> : vector<16x128xf32>
    %6 = tpu.matmul %4, %5, %cst {dimension_numbers = #tpu.dot_dimension_numbers<[1], [0], [0], [1], [0, 0, 1, 1], [], []>} : vector<16x128xbf16>, vector<128x128xbf16>, vector<16x128xf32> -> vector<16x128xf32>
    %7 = arith.addf %3, %6 : vector<16x128xf32>
    %c0_6 = arith.constant 0 : index
    %c0_7 = arith.constant 0 : index
    %8 = vector.load %arg7[%c0_6, %c0_7] : memref<16x128xf32, #tpu.memory_space<vmem>>, vector<16x128xf32>
    tpu.vector_store %arg7[%c0_6, %c0_7], %7 {strides = array<i32>} : memref<16x128xf32, #tpu.memory_space<vmem>>, vector<16x128xf32>,
    %c0_i32_8 = arith.constant 0 : i32
    %9 = arith.cmpi eq, %arg2, %c0_i32_8 : i32
    %10 = arith.extui %9 : i1 to i32
    %c0_i32_9 = arith.constant 0 : i32
    %11 = arith.cmpi ne, %10, %c0_i32_9 : i32
    scf.if %11 {
      %c0_10 = arith.constant 0 : index
      %c0_11 = arith.constant 0 : index
      %12 = vector.load %arg7[%c0_10, %c0_11] : memref<16x128xf32, #tpu.memory_space<vmem>>, vector<16x128xf32>
      %c0_12 = arith.constant 0 : index
      %c0_13 = arith.constant 0 : index
      %13 = vector.load %arg5[%c0_12, %c0_13] : memref<1x128xf32, #tpu.memory_space<vmem>>, vector<1x128xf32>
      %14 = vector.broadcast %13 : vector<1x128xf32> to vector<16x128xf32>
      %15 = arith.addf %12, %14 : vector<16x128xf32>
      %cst_14 = arith.constant 0.000000e+00 : f32
      %16 = vector.broadcast %cst_14 : f32 to vector<16x128xf32>
      %17 = arith.maximumf %15, %16 : vector<16x128xf32>
      %c0_15 = arith.constant 0 : index
      %c0_16 = arith.constant 0 : index
      %18 = vector.load %arg6[%c0_15, %c0_16] : memref<16x128xf32, #tpu.memory_space<vmem>>, vector<16x128xf32>
      tpu.vector_store %arg6[%c0_15, %c0_16], %17 {strides = array<i32>} : memref<16x128xf32, #tpu.memory_space<vmem>>, vector<16x128xf32>,
    } else {
    }
    return
  }
  func.func @transform_0(%arg0: i32, %arg1: i32, %arg2: i32) -> (i32, i32) {
    %c0_i32 = arith.constant 0 : i32
    return %arg0, %arg2 : i32, i32
  }
  func.func @transform_1(%arg0: i32, %arg1: i32, %arg2: i32) -> (i32, i32) {
    %c0_i32 = arith.constant 0 : i32
    return %arg2, %arg1 : i32, i32
  }
  func.func @transform_2(%arg0: i32, %arg1: i32, %arg2: i32) -> (i32, i32) {
    %c0_i32 = arith.constant 0 : i32
    %c0_i32_0 = arith.constant 0 : i32
    return %c0_i32, %arg1 : i32, i32
  }
  func.func @transform_3(%arg0: i32, %arg1: i32, %arg2: i32) -> (i32, i32) {
    %c0_i32 = arith.constant 0 : i32
    return %arg0, %arg1 : i32, i32
  }
}

</mosaic_0001>

<bundles_post_ra>
// kernel: tpu_custom_call.1
= control target key start
LH: loop header
LB: loop body
LE: loop exit
PB: predicated region body
PF: predicated region fallthrough
CT: control target
= control target key end

     0   :  { %8 = vsyncpa [#allocation4], 0  ;;  %s402_s0 = inlined_call_operand.hbm [shape: bf16[16,128], index: 0, kind: input, shape index: {}]   ;;  %s403_s1 = inlined_call_operand.hbm [shape: bf16[128,128], index: 1, kind: input, shape index: {}]   ;;  %s404_s2 = inlined_call_operand.vmem [shape: f32[1,128], index: 2, kind: input, shape index: {}]   ;;  %s405_s3 = inlined_call_operand.hbm [shape: f32[16,128], index: 3, kind: output, shape index: {}]  }
   0x1   :  { %9 = vsyncpa [#allocation7], 0 }
   0x2   :  { %10 = vsyncpa [#allocation5], 0  ;;  %s334_s12 = smov [#allocation3]   ;;  %s262_s16 = scalar_lea.hbm %s402_s0, 128 }
   0x3   :  { %s16_s13 = sshll.u32 %s334_s12, 4  ;;  %p263_p0 = scmp.ne.s32.totalorder %s402_s0, %s262_s16  ;;  %s17_s13 = int_to_ptr.vmem [resolvable:$true] %s16_s13 }
   0x4   :  { %p266_p1 = scmp.lt.u32.totalorder %s262_s16, %s402_s0 }
   0x6   :  { %p268_p2 = pnand %p266_p1, %p263_p0 }
   0x8   :  { %271 = shalt.err (!%p268_p2)
}
   0x9   :  { %s272_s21 = scalar_lea.vmem %s17_s13, 128  ;;  %p277_p4 = scmp.lt.s32.totalorder %s17_s13, %s17_s13 }
   0xa   :  { %p273_p3 = scmp.ne.s32.totalorder %s17_s13, %s272_s21  ;;  %p278_p5 = scmp.lt.s32.totalorder %s272_s21, %s272_s21 }
   0xc   :  { %p279_p6 = por %p278_p5, %p277_p4 }
   0xe   :  { %p280_p7 = pnand %p279_p6, %p273_p3 }
  0x10   :  { %283 = shalt.err (!%p280_p7)
}
  0x11   :  { %s335_s22 = smov 64   ;;  %s336_s23 = smov 4  }
  0x12   :  { %22 = dma.hbm_to_vmem [thread:$0]  %s402_s0, 128, %s17_s13, [#allocation4], %s335_s22, %s335_s22, %s336_s23  }
  0x13   :  { %s337_s26 = smov [#allocation6]   ;;  %s284_s30 = scalar_lea.hbm %s403_s1, 1024 }
  0x14   :  { %s28_s27 = sshll.u32 %s337_s26, 4  ;;  %p285_p8 = scmp.ne.s32.totalorder %s403_s1, %s284_s30  ;;  %s29_s27 = int_to_ptr.vmem [resolvable:$true] %s28_s27 }
  0x15   :  { %p288_p9 = scmp.lt.u32.totalorder %s284_s30, %s403_s1 }
  0x17   :  { %p290_p10 = pnand %p288_p9, %p285_p8 }
  0x19   :  { %293 = shalt.err (!%p290_p10)
}
  0x1a   :  { %s294_s8 = scalar_lea.vmem %s29_s27, 1024  ;;  %p299_p12 = scmp.lt.s32.totalorder %s29_s27, %s29_s27 }
  0x1b   :  { %p295_p11 = scmp.ne.s32.totalorder %s29_s27, %s294_s8  ;;  %p300_p13 = scmp.lt.s32.totalorder %s294_s8, %s294_s8 }
  0x1d   :  { %p301_p0 = por %p300_p13, %p299_p12 }
  0x1f   :  { %p302_p1 = pnand %p301_p0, %p295_p11 }
  0x21   :  { %305 = shalt.err (!%p302_p1)
}
  0x22   :  { %34 = dma.hbm_to_vmem [thread:$0]  %s403_s1, 1024, %s29_s27, [#allocation7], %s335_s22, %s335_s22, %s336_s23  }
  0x23   :  { %328 = dma.done.wait [#allocation4], 128  }
  0x24   :  { %329 = vsyncadd [#allocation4], 4294967168 }
  0x25   :  { %330 = dma.done.wait [#allocation7], 1024  }
  0x26   :  { %331 = vsyncadd [#allocation7], 4294966272  ;;  %v338_v0 = vmov 0.0   ;;  %vm339_vm0 = vmmov 0   ;;  %v253_v1 = vld [vmem:[#allocation6] sm:$0xff]   ;;  %v254_v2 = vld [vmem:[#allocation6 + $0x8] sm:$0xff]  }
  0x27   :  { %224 = vmatprep.subr.bf16.mxu0 %v338_v0  ;;  %240 = vmatprep.mubr.msk.bf16.mxu0 %vm339_vm0, %v338_v0  ;;  %v255_v3 = vld [vmem:[#allocation6 + $0x10] sm:$0xff]   ;;  %v256_v4 = vld [vmem:[#allocation6 + $0x18] sm:$0xff]   ;;  %v257_v5 = vld [vmem:[#allocation6 + $0x20] sm:$0xff]   ;;  %s340_s11 = smov [#allocation8]  }
  0x28   :  { %225 = vmatpush3.bf16.msra.mxu0 %v253_v1  ;;  %v258_v6 = vld [vmem:[#allocation6 + $0x28] sm:$0xff]   ;;  %v259_v7 = vld [vmem:[#allocation6 + $0x30] sm:$0xff]   ;;  %v260_v8 = vld [vmem:[#allocation6 + $0x38] sm:$0xff]   ;;  %s192_s12 = sshll.u32 %s340_s11, 4  ;;  %s193_s12 = int_to_ptr.vmem [resolvable:$true] %s192_s12 }
  0x29   :  { %226 = vmatprep.subr.bf16.mxu0 %v338_v0  ;;  %v261_v9 = vld [vmem:[#allocation3] sm:$0xff]   ;;  %s306_s13 = scalar_lea.vmem %s193_s12, 256  ;;  %p311_p3 = scmp.lt.s32.totalorder %s193_s12, %s193_s12 }
  0x2a   :  { %v214_v10 = vld [vmem:[%s404_s2] ss:$0 sm:$0xff]  ;;  %p307_p2 = scmp.ne.s32.totalorder %s193_s12, %s306_s13  ;;  %p312_p4 = scmp.lt.s32.totalorder %s306_s13, %s306_s13 }
  0x2c   :  { %227 = vmatpush3.bf16.msra.mxu0 %v254_v2  ;;  %p313_p5 = por %p312_p4, %p311_p3 }
  0x2d   :  { %228 = vmatprep.subr.bf16.mxu0 %v338_v0 }
  0x2e   :  { %p314_p6 = pnand %p313_p5, %p307_p2 }
  0x30   :  { %229 = vmatpush3.bf16.msra.mxu0 %v255_v3 }
  0x31   :  { %230 = vmatprep.subr.bf16.mxu0 %v338_v0 }
  0x34   :  { %231 = vmatpush3.bf16.msra.mxu0 %v256_v4 }
  0x35   :  { %232 = vmatprep.subr.bf16.mxu0 %v338_v0 }
  0x38   :  { %233 = vmatpush3.bf16.msra.mxu0 %v257_v5 }
  0x39   :  { %234 = vmatprep.subr.bf16.mxu0 %v338_v0 }
  0x3c   :  { %235 = vmatpush3.bf16.msra.mxu0 %v258_v6 }
  0x3d   :  { %236 = vmatprep.subr.bf16.mxu0 %v338_v0 }
  0x40   :  { %237 = vmatpush3.bf16.msra.mxu0 %v259_v7 }
  0x41   :  { %238 = vmatprep.subr.bf16.mxu0 %v338_v0 }
  0x44   :  { %239 = vmatpush3.bf16.msra.mxu0 %v260_v8 }
  0x47   :  { %241 = vmatmul.mubr.bf16.vlgmr.msra.gmra.mrb[0].mxu0 %v261_v9 }
 0x11a   :  { %v158_v11 = vpop.f32.mrb[0].mxu0 }
 0x11b   :  { %v181_v12 = vadd.f32 %v214_v10, %v158_v11  ;;  %v242_v13 = vpop.f32.mrb[1].mxu0 }
 0x11c   :  { %v161_v14 = vpop.f32.mrb[2].mxu0 }
 0x11d   :  { %v183_v15 = vmax.f32 %v181_v12, 0.0  ;;  %v182_v16 = vadd.f32 %v214_v10, %v161_v14  ;;  %v243_v17 = vpop.f32.mrb[3].mxu0 }
 0x11f   :  { %185 = vst [vmem:[#allocation8] sm:$0xff] %v183_v15  ;;  %v184_v18 = vmax.f32 %v182_v16, 0.0 }
 0x121   :  { %186 = vst [vmem:[#allocation8 + $0x8] sm:$0xff] %v184_v18 }
 0x122   :  { %317 = shalt.err (!%p314_p6)
}
 0x123   :  { %s318_s15 = scalar_lea.hbm %s405_s3, 256 }
 0x124   :  { %p319_p7 = scmp.ne.s32.totalorder %s405_s3, %s318_s15  ;;  %p322_p8 = scmp.lt.u32.totalorder %s318_s15, %s405_s3 }
 0x126   :  { %p324_p9 = pnand %p322_p8, %p319_p7 }
 0x128   :  { %327 = shalt.err (!%p324_p9)
}
 0x129   :  { %s341_s20 = smov 128   ;;  %s342_s21 = smov 8  }
 0x12a   :  { %198 = dma.vmem_to_hbm [thread:$0]  %s193_s12, 256, %s405_s3, [#allocation5], %s341_s20, %s341_s20, %s342_s21  }
 0x12b   :  { %332 = dma.done.wait [#allocation5], 256  }
 0x12c   :  { %333 = vsyncadd [#allocation5], 4294967040 }
 0x12d   :  { %202 = vsyncpa [#allocation4], 1 }
 0x12e   :  { %203 = vsyncpa [#allocation7], 1 }
 0x12f   :  { %204 = vsyncpa [#allocation5], 1 }

</bundles_post_ra>
